<compile_context>
chip_gen: v7x
topology: tpu7x:2x2x1
jax: 0.10.0
libtpu: 0.0.40
codegen_flags: <defaults>
</compile_context>

<pallas_src>
import math

import jax
import jax.numpy as jnp
from jax.experimental import pallas as pl
from jax.experimental.pallas import tpu as pltpu

LANE = 128


def _round_up(v, m):
    return ((v + m - 1) // m) * m


def make_fused_gnn_kernel(num_layers, neighbor_dtype):
    """Fused kernel for `num_layers` GNN layers (ReLU), one graph per grid step.

    Ref order:
      x_ref    (1, N, D_in)        node features, f32
      adj_ref  (1, N, N)           dense 0/1 adjacency, bf16 (exact)
      per layer l:
        ws_t_l  (D_in_l, Dp_out_l)  W_self^T, zero-padded to 128-lane out dim
        wn_cs_l (1, Dp_out_l)       column-sum of W_neigh^T, zero-padded
      out_ref  (1, N, Dp_out_last)  lane-dense (128-padded) output
    """

    def kernel(x_ref, adj_ref, *refs):
        out_ref = refs[-1]
        w_refs = refs[:-1]

        x = x_ref[0].astype(jnp.float32)          # (N, D_in)
        # adj is stored as bf16 (exact for 0/1).  For the default fast path
        # the adjacency matmul stays in bf16 (native MXU path, f32 accum);
        # neighbor_dtype=float32 upcasts instead for bit-accurate validation.
        adj = adj_ref[0].astype(neighbor_dtype)   # (N, N)

        # Unrolled (traced once) layer stack; hidden activations stay in
        # VMEM/vregs and never round-trip to HBM.
        for li in range(num_layers):
            ws_t = w_refs[2 * li][...]             # (D_in_l, Dp_out)
            wn_cs = w_refs[2 * li + 1][...]        # (1, Dp_out)

            # Rank-1 neighbor term:
            #   broadcast(adj @ x[:,0:1]) @ W_neigh^T
            #     == adj @ (x[:, 0:1] * colsum(W_neigh^T))
            # which keeps the adjacency matmul lane-dense (N, Dp_out).
            rhs = (x[:, 0:1] * wn_cs).astype(neighbor_dtype)   # (N, Dp_out)

            h = (jnp.dot(x, ws_t, preferred_element_type=jnp.float32)
                 + jnp.dot(adj, rhs, preferred_element_type=jnp.float32))
            x = jnp.maximum(h, 0.0)                # ReLU

        out_ref[0] = x.astype(out_ref.dtype)

    return kernel


def prepare_params(params, input_dim):
    """One-time weight preprocessing (outside the forward path).

    * W_self pre-transposed.
    * W_neigh pre-reduced to its input-dim column sum (rank-1 rewrite).
    * Every layer's OUTPUT dim zero-padded to a multiple of 128 lanes so
      activations / output stores are lane-dense; every layer's INPUT rows are
      padded to match the previous layer's padded output.  Zero padding is
      exact (padded activations are ReLU(0)=0 and padded weight rows/cols 0).
    """
    prepared = []
    d_in_eff = input_dim
    for (w_self, w_neigh) in params:
        w_self = jnp.asarray(w_self, jnp.float32)      # (d_out, d_in)
        w_neigh = jnp.asarray(w_neigh, jnp.float32)    # (d_out, d_in)
        d_out, d_in = w_self.shape
        d_out_p = _round_up(d_out, LANE)

        ws_t = jnp.zeros((d_in_eff, d_out_p), jnp.float32)
        ws_t = ws_t.at[:d_in, :d_out].set(w_self.T)

        wn_cs = jnp.zeros((1, d_out_p), jnp.float32)
        wn_cs = wn_cs.at[0, :d_out].set(jnp.sum(w_neigh, axis=1))

        prepared.append((ws_t, wn_cs))
        d_in_eff = d_out_p
    return prepared


def gnn_module_fused(x, adj, prepared_params, out_dim,
                     *, neighbor_dtype=jnp.bfloat16):
    """Whole GNNModule forward as ONE Pallas kernel over a batch of graphs.

    x   : (B, N, D_in) or (N, D_in), float32
    adj : (B, N, N)    or (N, N),    dense 0/1 (any real dtype; cast to bf16)
    """
    squeeze = x.ndim == 2
    if squeeze:
        x, adj = x[None], adj[None]
    B, N, d_in = x.shape
    num_layers = len(prepared_params)
    d_out_p = prepared_params[-1][0].shape[1]

    x = x.astype(jnp.float32)
    adj = adj.astype(jnp.bfloat16)   # exact for 0/1; halves adj HBM/VMEM bytes

    flat_weights = []
    in_specs = [
        pl.BlockSpec((1, N, d_in), lambda b: (b, 0, 0)),
        pl.BlockSpec((1, N, N), lambda b: (b, 0, 0)),
    ]
    for ws_t, wn_cs in prepared_params:
        flat_weights += [ws_t, wn_cs]
        # Constant block index -> weights are DMA'd once and stay
        # VMEM-resident across the whole batch grid.
        in_specs += [
            pl.BlockSpec(ws_t.shape, lambda b: (0, 0)),
            pl.BlockSpec(wn_cs.shape, lambda b: (0, 0)),
        ]

    # Explicit scoped-VMEM budget: double-buffered per-graph blocks + resident
    # weights + headroom, kept well under v7x's 64 MiB physical VMEM.
    per_graph_bytes = (N * d_in * 4) + (N * N * 2) + (N * d_out_p * 4)
    weight_bytes = sum(int(w.size) * w.dtype.itemsize for w in flat_weights)
    vmem_limit = int(min(48 << 20,
                         max(8 << 20, 4 * (2 * per_graph_bytes + weight_bytes))))

    kernel = make_fused_gnn_kernel(num_layers, neighbor_dtype)

    out_padded = pl.pallas_call(
        kernel,
        out_shape=jax.ShapeDtypeStruct((B, N, d_out_p), jnp.float32),
        grid=(B,),
        in_specs=in_specs,
        out_specs=pl.BlockSpec((1, N, d_out_p), lambda b: (b, 0, 0)),
        compiler_params=pltpu.CompilerParams(
            # Graphs are independent: shards across v7x's two TensorCores,
            # free elsewhere.
            dimension_semantics=("parallel",),
            vmem_limit_bytes=vmem_limit),
    )(x, adj, *flat_weights)

    out = out_padded[:, :, :out_dim]   # drop lane padding outside the kernel
    return out[0] if squeeze else out


# ---------------------------------------------------------------------------
# Pure-JAX references.
# ---------------------------------------------------------------------------
def ref_layer(x, adj, w_self, w_neigh):
    # Literal transcription of GNNLayer.forward: the aggregated value for node
    # i is the neighbor-sum of the FIRST feature broadcast across the row
    # (zero if the node has no neighbors) == broadcast(adj @ x[:, 0:1]).
    neigh_agg = jnp.broadcast_to(adj @ x[:, 0:1], x.shape)
    return jnp.maximum(x @ w_self.T + neigh_agg @ w_neigh.T, 0.0)


def ref_module(x, adj, params):
    for (w_self, w_neigh) in params:
        x = ref_layer(x, adj, w_self, w_neigh)
    return x


def ref_module_kernel_math(x, adj, prepared, out_dim, neighbor_dtype):
    """Precision-matched reference mirroring the kernel's math (rank-1 rewrite,
    padded weights, bf16/f32 neighbor operands, f32 accumulation)."""
    adj = adj.astype(jnp.bfloat16).astype(neighbor_dtype)
    for ws_t, wn_cs in prepared:
        rhs = (x[:, 0:1] * wn_cs).astype(neighbor_dtype)
        h = (jnp.dot(x, ws_t, preferred_element_type=jnp.float32)
             + jnp.dot(adj, rhs, preferred_element_type=jnp.float32))
        x = jnp.maximum(h, 0.0)
    return x[:, :out_dim]


def init_linear_weight(key, out_dim, in_dim):
    # nn.Linear default: U(-1/sqrt(fan_in), 1/sqrt(fan_in)), deterministic here.
    bound = 1.0 / math.sqrt(in_dim)
    return jax.random.uniform(key, (out_dim, in_dim), jnp.float32,
                              minval=-bound, maxval=bound)


if __name__ == "__main__":
    # Small shapes consistent with the module; a batch of graphs feeds the
    # "parallel" grid axis.
    B = 4            # number of graphs (batch / grid axis)
    N = 8            # nodes per graph
    INPUT_DIM = 16
    HIDDEN_DIM = 32
    OUTPUT_DIM = 8
    NUM_LAYERS = 2   # module default: [in->hidden, hidden->out]

    key = jax.random.PRNGKey(0)
    k_x, k_adj, k_w = jax.random.split(key, 3)

    x = jax.random.normal(k_x, (B, N, INPUT_DIM), jnp.float32)
    adj = (jax.random.uniform(k_adj, (B, N, N)) < 0.4).astype(jnp.float32)

    # Layer params: (W_self, W_neigh) per layer, nn.Linear-style init.
    dims = [INPUT_DIM] + [HIDDEN_DIM] * (NUM_LAYERS - 1) + [OUTPUT_DIM]
    params = []
    wkeys = jax.random.split(k_w, 2 * NUM_LAYERS)
    for li in range(NUM_LAYERS):
        d_in, d_out = dims[li], dims[li + 1]
        params.append((init_linear_weight(wkeys[2 * li], d_out, d_in),
                       init_linear_weight(wkeys[2 * li + 1], d_out, d_in)))

    # One-time preprocessing (transpose, W_neigh column-sum, 128-lane padding).
    prepared = prepare_params(params, INPUT_DIM)

    # 1) Exact-semantics check: f32 neighbor path vs. the literal f32 reference.
    out_f32 = jax.block_until_ready(
        gnn_module_fused(x, adj, prepared, OUTPUT_DIM,
                         neighbor_dtype=jnp.float32))
    expected = jnp.stack([ref_module(x[b], adj[b], params) for b in range(B)])
    assert out_f32.shape == (B, N, OUTPUT_DIM)
    assert jnp.allclose(out_f32, expected, atol=1e-4, rtol=1e-5), \
        "f32 path mismatch vs reference"

    # 2) Default fast path (bf16 adjacency matmul, f32 accumulation) vs. a
    #    precision-matched reference computing the same math.
    out = jax.block_until_ready(gnn_module_fused(x, adj, prepared, OUTPUT_DIM))
    expected_mixed = jnp.stack([
        ref_module_kernel_math(x[b], adj[b], prepared, OUTPUT_DIM, jnp.bfloat16)
        for b in range(B)])
    assert out.shape == (B, N, OUTPUT_DIM)
    assert jnp.allclose(out, expected_mixed, atol=1e-3, rtol=1e-3), \
        "bf16 path mismatch vs precision-matched reference"

    print("KERNEL_OK")
</pallas_src>

<mosaic_0001>
module attributes {stable_mosaic.version = 11 : i64} {
  func.func @kernel(%arg0: i32, %arg1: memref<1x8x16xf32, #tpu.memory_space<vmem>>, %arg2: memref<1x8x8xbf16, #tpu.memory_space<vmem>>, %arg3: memref<16x128xf32, #tpu.memory_space<vmem>>, %arg4: memref<1x128xf32, #tpu.memory_space<vmem>>, %arg5: memref<128x128xf32, #tpu.memory_space<vmem>>, %arg6: memref<1x128xf32, #tpu.memory_space<vmem>>, %arg7: memref<1x8x128xf32, #tpu.memory_space<vmem>>) attributes {dimension_semantics = [#tpu.dimension_semantics<parallel>], iteration_bounds = array<i64: 4>, scalar_prefetch = 0 : i64, scratch_operands = 0 : i64, tpu.core_type = #tpu.core_type<tc>, window_params = [{transform_indices = @transform_0, window_bounds = array<i64: 1, 8, 16>}, {transform_indices = @transform_1, window_bounds = array<i64: 1, 8, 8>}, {pipeline_mode = #tpu.pipeline_mode<synchronous>, transform_indices = @transform_2, window_bounds = array<i64: 16, 128>}, {pipeline_mode = #tpu.pipeline_mode<synchronous>, transform_indices = @transform_3, window_bounds = array<i64: 1, 128>}, {pipeline_mode = #tpu.pipeline_mode<synchronous>, transform_indices = @transform_4, window_bounds = array<i64: 128, 128>}, {pipeline_mode = #tpu.pipeline_mode<synchronous>, transform_indices = @transform_5, window_bounds = array<i64: 1, 128>}, {transform_indices = @transform_6, window_bounds = array<i64: 1, 8, 128>}]} {
    %c0 = arith.constant 0 : index
    %c0_0 = arith.constant 0 : index
    %c0_1 = arith.constant 0 : index
    %0 = vector.load %arg1[%c0, %c0_0, %c0_1] : memref<1x8x16xf32, #tpu.memory_space<vmem>>, vector<1x8x16xf32>
    %1 = vector.shape_cast %0 : vector<1x8x16xf32> to vector<8x16xf32>
    %c0_2 = arith.constant 0 : index
    %c0_3 = arith.constant 0 : index
    %c0_4 = arith.constant 0 : index
    %2 = vector.load %arg2[%c0_2, %c0_3, %c0_4] : memref<1x8x8xbf16, #tpu.memory_space<vmem>>, vector<1x8x8xbf16>
    %3 = vector.shape_cast %2 : vector<1x8x8xbf16> to vector<8x8xbf16>
    %4 = arith.extf %3 : vector<8x8xbf16> to vector<8x8xf32>
    %c0_5 = arith.constant 0 : index
    %c0_6 = arith.constant 0 : index
    %5 = vector.load %arg3[%c0_5, %c0_6] : memref<16x128xf32, #tpu.memory_space<vmem>>, vector<16x128xf32>
    %c0_7 = arith.constant 0 : index
    %c0_8 = arith.constant 0 : index
    %6 = vector.load %arg4[%c0_7, %c0_8] : memref<1x128xf32, #tpu.memory_space<vmem>>, vector<1x128xf32>
    %7 = vector.extract_strided_slice %1 {offsets = [0, 0], sizes = [8, 1], strides = [1, 1]} : vector<8x16xf32> to vector<8x1xf32>
    %8 = vector.broadcast %7 : vector<8x1xf32> to vector<8x128xf32>
    %9 = vector.broadcast %6 : vector<1x128xf32> to vector<8x128xf32>
    %10 = arith.mulf %8, %9 : vector<8x128xf32>
    %cst = arith.constant dense<0.000000e+00> : vector<8x128xf32>
    %11 = tpu.matmul %1, %5, %cst {dimension_numbers = #tpu.dot_dimension_numbers<[1], [0], [0], [1], [0, 0, 1, 1], [], []>} : vector<8x16xf32>, vector<16x128xf32>, vector<8x128xf32> -> vector<8x128xf32>
    %cst_9 = arith.constant dense<0.000000e+00> : vector<8x128xf32>
    %12 = tpu.matmul %4, %10, %cst_9 {dimension_numbers = #tpu.dot_dimension_numbers<[1], [0], [0], [1], [0, 0, 1, 1], [], []>} : vector<8x8xf32>, vector<8x128xf32>, vector<8x128xf32> -> vector<8x128xf32>
    %13 = arith.addf %11, %12 : vector<8x128xf32>
    %cst_10 = arith.constant 0.000000e+00 : f32
    %14 = vector.broadcast %cst_10 : f32 to vector<8x128xf32>
    %15 = arith.maximumf %13, %14 : vector<8x128xf32>
    %c0_11 = arith.constant 0 : index
    %c0_12 = arith.constant 0 : index
    %16 = vector.load %arg5[%c0_11, %c0_12] : memref<128x128xf32, #tpu.memory_space<vmem>>, vector<128x128xf32>
    %c0_13 = arith.constant 0 : index
    %c0_14 = arith.constant 0 : index
    %17 = vector.load %arg6[%c0_13, %c0_14] : memref<1x128xf32, #tpu.memory_space<vmem>>, vector<1x128xf32>
    %18 = vector.extract_strided_slice %15 {offsets = [0, 0], sizes = [8, 1], strides = [1, 1]} : vector<8x128xf32> to vector<8x1xf32>
    %19 = vector.broadcast %18 : vector<8x1xf32> to vector<8x128xf32>
    %20 = vector.broadcast %17 : vector<1x128xf32> to vector<8x128xf32>
    %21 = arith.mulf %19, %20 : vector<8x128xf32>
    %cst_15 = arith.constant dense<0.000000e+00> : vector<8x128xf32>
    %22 = tpu.matmul %15, %16, %cst_15 {dimension_numbers = #tpu.dot_dimension_numbers<[1], [0], [0], [1], [0, 0, 1, 1], [], []>} : vector<8x128xf32>, vector<128x128xf32>, vector<8x128xf32> -> vector<8x128xf32>
    %cst_16 = arith.constant dense<0.000000e+00> : vector<8x128xf32>
    %23 = tpu.matmul %4, %21, %cst_16 {dimension_numbers = #tpu.dot_dimension_numbers<[1], [0], [0], [1], [0, 0, 1, 1], [], []>} : vector<8x8xf32>, vector<8x128xf32>, vector<8x128xf32> -> vector<8x128xf32>
    %24 = arith.addf %22, %23 : vector<8x128xf32>
    %cst_17 = arith.constant 0.000000e+00 : f32
    %25 = vector.broadcast %cst_17 : f32 to vector<8x128xf32>
    %26 = arith.maximumf %24, %25 : vector<8x128xf32>
    %c0_18 = arith.constant 0 : index
    %c0_19 = arith.constant 0 : index
    %c0_20 = arith.constant 0 : index
    %27 = vector.load %arg7[%c0_18, %c0_19, %c0_20] : memref<1x8x128xf32, #tpu.memory_space<vmem>>, vector<1x8x128xf32>
    %28 = vector.shape_cast %27 : vector<1x8x128xf32> to vector<8x128xf32>
    %29 = vector.shape_cast %26 : vector<8x128xf32> to vector<1x8x128xf32>
    tpu.vector_store %arg7[%c0_18, %c0_19, %c0_20], %29 {strides = array<i32>} : memref<1x8x128xf32, #tpu.memory_space<vmem>>, vector<1x8x128xf32>,
    return
  }
  func.func @transform_0(%arg0: i32) -> (i32, i32, i32) {
    %c0_i32 = arith.constant 0 : i32
    %c0_i32_0 = arith.constant 0 : i32
    %c0_i32_1 = arith.constant 0 : i32
    return %arg0, %c0_i32, %c0_i32_0 : i32, i32, i32
  }
  func.func @transform_1(%arg0: i32) -> (i32, i32, i32) {
    %c0_i32 = arith.constant 0 : i32
    %c0_i32_0 = arith.constant 0 : i32
    %c0_i32_1 = arith.constant 0 : i32
    return %arg0, %c0_i32, %c0_i32_0 : i32, i32, i32
  }
  func.func @transform_2(%arg0: i32) -> (i32, i32) {
    %c0_i32 = arith.constant 0 : i32
    %c0_i32_0 = arith.constant 0 : i32
    %c0_i32_1 = arith.constant 0 : i32
    return %c0_i32, %c0_i32_0 : i32, i32
  }
  func.func @transform_3(%arg0: i32) -> (i32, i32) {
    %c0_i32 = arith.constant 0 : i32
    %c0_i32_0 = arith.constant 0 : i32
    %c0_i32_1 = arith.constant 0 : i32
    return %c0_i32, %c0_i32_0 : i32, i32
  }
  func.func @transform_4(%arg0: i32) -> (i32, i32) {
    %c0_i32 = arith.constant 0 : i32
    %c0_i32_0 = arith.constant 0 : i32
    %c0_i32_1 = arith.constant 0 : i32
    return %c0_i32, %c0_i32_0 : i32, i32
  }
  func.func @transform_5(%arg0: i32) -> (i32, i32) {
    %c0_i32 = arith.constant 0 : i32
    %c0_i32_0 = arith.constant 0 : i32
    %c0_i32_1 = arith.constant 0 : i32
    return %c0_i32, %c0_i32_0 : i32, i32
  }
  func.func @transform_6(%arg0: i32) -> (i32, i32, i32) {
    %c0_i32 = arith.constant 0 : i32
    %c0_i32_0 = arith.constant 0 : i32
    %c0_i32_1 = arith.constant 0 : i32
    return %arg0, %c0_i32, %c0_i32_0 : i32, i32, i32
  }
}

</mosaic_0001>

<bundles_post_ra>
// kernel: tpu_custom_call.1
= control target key start
LH: loop header
LB: loop body
LE: loop exit
PB: predicated region body
PF: predicated region fallthrough
CT: control target
= control target key end

     0   :  { %s1531_s0 = inlined_call_operand.hbm [shape: f32[4,8,16], index: 0, kind: input, shape index: {}]   ;;  %s1532_s1 = inlined_call_operand.hbm [shape: bf16[4,8,8], index: 1, kind: input, shape index: {}]   ;;  %s1533_s2 = inlined_call_operand.hbm [shape: f32[16,128], index: 2, kind: input, shape index: {}]   ;;  %s1534_s3 = inlined_call_operand.vmem [shape: f32[1,128], index: 3, kind: input, shape index: {}]   ;;  %s1535_s4 = inlined_call_operand.hbm [shape: f32[128,128], index: 4, kind: input, shape index: {}]   ;;  %s1536_s5 = inlined_call_operand.vmem [shape: f32[1,128], index: 5, kind: input, shape index: {}]   ;;  %s1537_s6 = inlined_call_operand.hbm [shape: f32[4,8,128], index: 6, kind: output, shape index: {}]  }
   0x1   :  { %1542 = sst [smem:[#allocation16_spill]] %s1531_s0 }
   0x2   :  { %1543 = sst [smem:[#allocation17_spill]] %s1533_s2 }
   0x3   :  { %11 = vsyncpa [#allocation3], 0 }
   0x4   :  { %13 = vsyncpa [#allocation3 + $0x1], 0 }
   0x5   :  { %14 = vsyncpa [#allocation6], 0 }
   0x6   :  { %16 = vsyncpa [#allocation6 + $0x1], 0 }
   0x7   :  { %17 = vsyncpa [#allocation9], 0 }
   0x8   :  { %18 = vsyncpa [#allocation4], 0 }
   0x9   :  { %20 = vsyncpa [#allocation4 + $0x1], 0  ;;  %s1247_s21 = smov 0   ;;  %s1249_s22 = smov 0  }
   0xa   :  { %s1251_s23 = smov 0   ;;  %s1253_s24 = smov 0  }
   0xb LB: > { %s1268_s25 = sadd.s32 4294967295, %s1199_s24   ;;  %s796_s26 = sadd.s32 4294967294, %s1199_s24   ;;  %s1199_s24 = sphi %s1253_s24, %s1565_s24   ;;  %s1195_s23 = sphi %s1251_s23, %s1564_s23   ;;  %s1191_s22 = sphi %s1249_s22, %s1563_s22   ;;  %s1187_s21 = sphi %s1247_s21, %s1562_s21  }
   0xc   : > { %p46_p0 = scmp.ne.s32.totalorder %s1191_s22, %s1187_s21  ;;  %p1538_p1 = scmp.eq.s32.totalorder %s1268_s25, 0 }
   0xd   : > { %p186_p3 = scmp.eq.s32.totalorder %s796_s26, 3  ;;  %p797_p5 = scmp.ge.s32.totalorder %s1199_s24, 1 }
   0xe   : > { %p1277_p4 = por %p1538_p1, %p46_p0  ;;  %p193_p7 = scmp.lt.s32.totalorder %s1199_s24, 5 }
   0xf   : > { %p1282_p6 = por %p186_p3, %p46_p0  ;;  %s1201_s30 = smov [#allocation7]  }
  0x10   : > { %s1544_s27 = scalar_select %p1277_p4, 1, 0 }
  0x11   : > { %s1545_s28 = scalar_select %p1282_p6, 1, 0 }
  0x12   : > { %p1287_p8 = pnand %p797_p5, %p193_p7  ;;  %s205_s7 = sshll.u32 %s1201_s30, 4  ;;  %s206_s7 = int_to_ptr.vmem [resolvable:$true] %s205_s7 }
  0x13   : > { %s1202_s9 = smov [#allocation8]   ;;  %s1548_s2 = sld [smem:[#allocation17_spill]] }
  0x14   : > { %s1546_s29 = scalar_select %p1287_p8, 1, 0 }
  0x15   : > { %p940_p9 = pneg %p1287_p8  ;;  %s221_s10 = sshll.u32 %s1202_s9, 4  ;;  %s1299_s10 = int_to_ptr.vmem [resolvable:$true] %s221_s10 }
  0x17   : > { %p1295_p10 = pnand %p940_p9, %p1538_p1 }
  0x19   : > { %s1005_s13 = scalar_lea.hbm %s1548_s2, 256  ;;  %p1007_p12 = pneg %p1295_p10 }
  0x1a   : > { %p1006_p11 = scmp.ne.s32.totalorder %s1548_s2, %s1005_s13  ;;  %p1012_p3 = scmp.lt.u32.totalorder %s1005_s13, %s1548_s2 }
  0x1c   : > { %p1008_p13 = pnand %p1007_p12, %p1006_p11 }
  0x1e   : > { %p1009_p0 = pneg %p1008_p13 }
  0x20   : > { %p1014_p5 = pnand %p1012_p3, %p1009_p0 }
  0x22   : > { %1017 = shalt.err (!%p1014_p5)
}
  0x23   : > { %s1018_s18 = scalar_lea.vmem %s206_s7, 256  ;;  %p1026_p2 = scmp.lt.s32.totalorder %s206_s7, %s206_s7 }
  0x24   : > { %p1019_p7 = scmp.ne.s32.totalorder %s206_s7, %s1018_s18  ;;  %p1027_p6 = scmp.lt.s32.totalorder %s1018_s18, %s1018_s18 }
  0x26   : > { %p1021_p9 = pnand %p1019_p7, %p1007_p12  ;;  %p1028_p4 = por %p1027_p6, %p1026_p2 }
  0x28   : > { %p1022_p1 = pneg %p1021_p9 }
  0x2a   : > { %p1029_p8 = pnand %p1028_p4, %p1022_p1 }
  0x2c   : > { %1032 = shalt.err (!%p1029_p8)
}
  0x2d   : > { %s1203_s19 = smov 128   ;;  %s1204_s20 = smov 8  }
  0x2e   : > { %943 = dma.hbm_to_vmem [thread:$0]  (!%p1295_p10), %s1548_s2, 256, %s206_s7, [#allocation6], %s1203_s19, %s1203_s19, %s1204_s20  }
  0x2f   : > { %s1033_s12 = scalar_lea.hbm %s1535_s4, 2048 }
  0x30   : > { %p1034_p11 = scmp.ne.s32.totalorder %s1535_s4, %s1033_s12  ;;  %p1040_p4 = scmp.lt.u32.totalorder %s1033_s12, %s1535_s4 }
  0x32   : > { %p1036_p1 = pnand %p1034_p11, %p1007_p12 }
  0x34   : > { %p1037_p2 = pneg %p1036_p1 }
  0x36   : > { %p1042_p6 = pnand %p1040_p4, %p1037_p2 }
  0x38   : > { %1045 = shalt.err (!%p1042_p6)
}
  0x39   : > { %s1046_s7 = scalar_lea.vmem %s1299_s10, 2048  ;;  %p1054_p3 = scmp.lt.s32.totalorder %s1299_s10, %s1299_s10 }
  0x3a   : > { %p1047_p8 = scmp.ne.s32.totalorder %s1299_s10, %s1046_s7  ;;  %p1055_p5 = scmp.lt.s32.totalorder %s1046_s7, %s1046_s7 }
  0x3c   : > { %p1049_p13 = pnand %p1047_p8, %p1007_p12  ;;  %p1056_p7 = por %p1055_p5, %p1054_p3 }
  0x3e   : > { %p1050_p0 = pneg %p1049_p13 }
  0x40   : > { %p1057_p9 = pnand %p1056_p7, %p1050_p0 }
  0x42   : > { %1060 = shalt.err (!%p1057_p9)
}
  0x43   : > { %946 = dma.hbm_to_vmem [thread:$0]  (!%p1295_p10), %s1535_s4, 2048, %s1299_s10, [#allocation9], %s1203_s19, %s1203_s19, %s1204_s20  }
  0x44   : > { %s1349_s26 = sadd.s32 1, %s1199_s24   ;;  %s33_s8 = sadd.s32 1, %s1195_s23 }
  0x45   : > { %s30_s30 = ssub.s32 %s1199_s24, %s1349_s26  ;;  %p40_p12 = scmp.ne.s32.totalorder %s1195_s23, %s1191_s22 }
  0x46   : > { %p31_p11 = scmp.eq.s32.totalorder %s30_s30, 0  ;;  %p41_p1 = scmp.eq.s32.totalorder %s1199_s24, 0 }
  0x47   : > { %p1549_p2 = scmp.eq.s32.totalorder %s1268_s25, 3  ;;  %p960_p6 = scmp.lt.s32.totalorder %s1199_s24, 4 }
  0x48   : > { %s1365_s11 = scalar_select %p31_p11, %s1195_s23, %s33_s8  }
  0x49   : > { %p1359_p4 = por %p1549_p2, %p40_p12  ;;  %p42_p8 = por %p41_p1, %p40_p12 }
  0x4a   : > { %s1368_s12 = sand.u32 1, %s1195_s23   ;;  %s802_s19 = sshll.u32 %s1199_s24, 7 }
  0x4b   : > { %s1550_s9 = scalar_select %p1359_p4, 1, 0 }
  0x4c   : > { %s801_s10 = sshll.u32 %s1368_s12, 3  ;;  %s1551_s0 = sld [smem:[#allocation16_spill]] }
  0x4d   : > { %s242_s15 = scalar_lea.vmem [#allocation2], %s801_s10  ;;  %p1379_p10 = pnand %p960_p6, %p42_p8 }
  0x4e   : > { %s249_s16 = sshll.u32 %s242_s15, 4  ;;  %s803_s18 = sshll.u32 %s1368_s12, 2  ;;  %s1377_s16 = int_to_ptr.vmem [resolvable:$true] %s249_s16 }
  0x4f   : > { %s239_s8 = scalar_lea.sflag [#allocation3], %s1368_s12  ;;  %p1063_p0 = pneg %p1379_p10 }
  0x52   : > { %s1375_s14 = scalar_lea.hbm %s1551_s0, %s802_s19  ;;  %s1066_s20 = scalar_lea.hbm %s1551_s0, 512 }
  0x53   : > { %s1061_s30 = scalar_lea.hbm %s1375_s14, 128  ;;  %p1067_p7 = scmp.lt.u32.totalorder %s1375_s14, %s1551_s0 }
  0x54   : > { %p1062_p13 = scmp.ne.s32.totalorder %s1375_s14, %s1061_s30  ;;  %p1068_p9 = scmp.lt.u32.totalorder %s1066_s20, %s1061_s30 }
  0x55   : > { %p1070_p11 = scmp.lt.u32.totalorder %s1061_s30, %s1375_s14 }
  0x56   : > { %p1064_p3 = pnand %p1063_p0, %p1062_p13  ;;  %p1069_p12 = por %p1068_p9, %p1067_p7 }
  0x58   : > { %p1065_p5 = pneg %p1064_p3  ;;  %p1071_p1 = por %p1070_p11, %p1069_p12 }
  0x5a   : > { %p1072_p2 = pnand %p1071_p1, %p1065_p5 }
  0x5c   : > { %1075 = shalt.err (!%p1072_p2)
}
  0x5d   : > { %s1076_s17 = scalar_lea.vmem %s1377_s16, 128  ;;  %s1205_s10 = smov [#allocation2]  }
  0x5e   : > { %p1077_p6 = scmp.ne.s32.totalorder %s1377_s16, %s1076_s17  ;;  %s1081_s19 = sshll.u32 %s1205_s10, 4  ;;  %s1082_s19 = int_to_ptr.vmem [resolvable:$false] %s1081_s19 }
  0x5f   : > { %s1083_s13 = scalar_lea.vmem %s1082_s19, 256  ;;  %p1084_p3 = scmp.lt.s32.totalorder %s1377_s16, %s1082_s19 }
  0x60   : > { %p1079_p8 = pnand %p1077_p6, %p1063_p0  ;;  %p1085_p7 = scmp.lt.s32.totalorder %s1083_s13, %s1076_s17 }
  0x62   : > { %p1080_p13 = pneg %p1079_p8  ;;  %p1086_p9 = por %p1085_p7, %p1084_p3 }
  0x64   : > { %p1087_p12 = pnand %p1086_p9, %p1080_p13 }
  0x66   : > { %1090 = shalt.err (!%p1087_p12)
}
  0x67   : > { %950 = dma.hbm_to_vmem [thread:$0]  (!%p1379_p10), %s1375_s14, 128, %s1377_s16, %s239_s8  }
  0x68   : > { %s804_s30 = sshll.u32 %s1199_s24, 6  ;;  %s260_s17 = scalar_lea.vmem [#allocation5], %s803_s18 }
  0x69   : > { %s1415_s10 = scalar_lea.hbm %s1532_s1, %s804_s30  ;;  %s267_s19 = sshll.u32 %s260_s17, 4  ;;  %s268_s19 = int_to_ptr.vmem [resolvable:$true] %s267_s19 }
  0x6a   : > { %s1553_s13 = sand.u32 1, %s1199_s24   ;;  %s1091_s2 = scalar_lea.hbm %s1415_s10, 64 }
  0x6b   : > { %s257_s0 = scalar_lea.sflag [#allocation6], %s1553_s13  ;;  %p1092_p5 = scmp.ne.s32.totalorder %s1415_s10, %s1091_s2 }
  0x6c   : > { %s1096_s8 = scalar_lea.hbm %s1532_s1, 256  ;;  %p1097_p2 = scmp.lt.u32.totalorder %s1415_s10, %s1532_s1 }
  0x6d   : > { %p1094_p11 = pnand %p1092_p5, %p1063_p0  ;;  %p1098_p6 = scmp.lt.u32.totalorder %s1096_s8, %s1091_s2 }
  0x6e   : > { %p1100_p13 = scmp.lt.u32.totalorder %s1091_s2, %s1415_s10 }
  0x6f   : > { %p1095_p1 = pneg %p1094_p11  ;;  %p1099_p8 = por %p1098_p6, %p1097_p2 }
  0x71   : > { %p1101_p3 = por %p1100_p13, %p1099_p8 }
  0x73   : > { %p1102_p7 = pnand %p1101_p3, %p1095_p1 }
  0x75   : > { %1105 = shalt.err (!%p1102_p7)
}
  0x76   : > { %s1106_s18 = scalar_lea.vmem %s268_s19, 64  ;;  %s1206_s20 = smov [#allocation5]  }
  0x77   : > { %p1107_p9 = scmp.ne.s32.totalorder %s268_s19, %s1106_s18  ;;  %s1111_s15 = sshll.u32 %s1206_s20, 4  ;;  %s1112_s15 = int_to_ptr.vmem [resolvable:$false] %s1111_s15 }
  0x78   : > { %s1113_s17 = scalar_lea.vmem %s1112_s15, 128  ;;  %p1114_p11 = scmp.lt.s32.totalorder %s268_s19, %s1112_s15 }
  0x79   : > { %p1109_p12 = pnand %p1107_p9, %p1063_p0  ;;  %p1115_p4 = scmp.lt.s32.totalorder %s1113_s17, %s1106_s18 }
  0x7b   : > { %p1110_p5 = pneg %p1109_p12  ;;  %p1116_p2 = por %p1115_p4, %p1114_p11 }
  0x7d   : > { %p1117_p6 = pnand %p1116_p2, %p1110_p5 }
  0x7f   : > { %1120 = shalt.err (!%p1117_p6)
}
  0x80   : > { %953 = dma.hbm_to_vmem [thread:$0]  (!%p1379_p10), %s1415_s10, 64, %s268_s19, %s257_s0  }
  0x81   : > { %p1554_p1 = scmp.ne.s32.totalorder %s1546_s29, 0 }
  0x82   : > { %s1443_s2 = sand.u32 (!%p1554_p1), 1, %s1191_s22   ;;  %p1555_p4 = scmp.ne.s32.totalorder (!%p1554_p1), %s1544_s27, 0 }
  0x83   : > { %276 = sbr.rel (%p1554_p1) target bundleno = 865 (0x361), region = 44  ;;  %s806_s13 = sshll.u32 (!%p1554_p1), %s1443_s2, 3 }
  0x84   : > { %s279_s14 = scalar_lea.sflag (!%p1554_p1), [#allocation3], %s1443_s2  ;;  %s282_s16 = scalar_lea.vmem (!%p1554_p1), [#allocation2], %s806_s13 }
  0x8a   : > { %1166 = dma.done.wait (%p1555_p4), %s279_s14, 128  }
  0x8b   : > { %1168 = vsyncadd (%p1555_p4), %s279_s14, 4294967168  ;;  %s287_s0 = sand.u32 1, %s1268_s25   ;;  %s807_s29 = sshll.u32 %s1443_s2, 2 }
  0x8c   : > { %s288_s7 = scalar_lea.sflag [#allocation6], %s287_s0  ;;  %s1455_s10 = scalar_lea.vmem [#allocation5], %s807_s29 }
  0x8d   : > { %1170 = dma.done.wait (%p1555_p4), %s288_s7, 64  }
  0x8e   : > { %1172 = vsyncadd (%p1555_p4), %s288_s7, 4294967232  ;;  %p1556_p10 = scmp.eq.s32.totalorder %s1268_s25, 0 }
  0x90   : > { %1174 = dma.done.wait (%p1556_p10), [#allocation6], 256   ;;  %p1557_p0 = pmov %p1556_p10 }
  0x92   : > { %1176 = vsyncadd (%p1557_p0), [#allocation6], 4294967040  ;;  %p1558_p8 = pmov %p1557_p0 }
  0x93   : > { %p1559_p13 = pmov %p1557_p0 }
  0x94   : > { %1178 = dma.done.wait (%p1558_p8), [#allocation9], 2048  }
  0x95   : > { %1180 = vsyncadd (%p1559_p13), [#allocation9], 4294965248  ;;  %v1207_v0 = vmov 0   ;;  %v333_v1 = vld [vmem:[%s282_s16] sm:$0xff]  ;;  %v1208_v2 = vmov 0.0   ;;  %vm1209_vm0 = vmmov 0  }
  0x96   : > { %1004 = vset.pattern.permute.xlu0 %v1207_v0  ;;  %844 = vmatprep.subr.mxu0 %v1208_v2  ;;  %v1210_v3 = vmov 0.0|0.0   ;;  %v499_v4 = vld [vmem:[#allocation8] sm:$0xff]  ;;  %v500_v5 = vld [vmem:[#allocation8 + $0x8] sm:$0xff]  ;;  %v501_v6 = vld [vmem:[#allocation8 + $0x10] sm:$0xff]  ;;  %vm351_vm1 = vcmask 64512   ;;  %vm425_vm2 = vcmask 130048  }
  0x97   : > { %341 = vperm.xlu0 %1004, %v333_v1   ;;  %846 = vmatprep.mubr.msk.f32.mxu0 %vm1209_vm0, %v1208_v2  ;;  %v900_v7 = vpack.c.bf16 %v500_v5, %v499_v4  ;;  %v502_v8 = vld [vmem:[#allocation8 + $0x18] sm:$0xff]  ;;  %v503_v10 = vld [vmem:[#allocation8 + $0x20] sm:$0xff]  ;;  %v504_v11 = vld [vmem:[#allocation8 + $0x28] sm:$0xff]  ;;  %s817_s30 = sshll.u32 %s1268_s25, 7  ;;  %s332_s18 = scalar_lea.vmem [#allocation10], %s806_s13 }
  0x98   : > { %893 = vmatprep.mubr.msk.f32.mxu1 %vm1209_vm0, %v1208_v2  ;;  %899 = vmatprep.subr.bf16.mxu1 %v1210_v3  ;;  %v903_v9 = vpack.c.bf16 %v502_v8, %v501_v6  ;;  %v906_v12 = vpack.c.bf16 %v504_v11, %v503_v10  ;;  %v505_v13 = vld [vmem:[#allocation8 + $0x30] sm:$0xff]  ;;  %v506_v14 = vld [vmem:[#allocation8 + $0x38] sm:$0xff]  ;;  %v507_v16 = vld [vmem:[#allocation8 + $0x40] sm:$0xff]  ;;  %s684_s20 = sshll.u32 %s332_s18, 4  ;;  %s1488_s14 = scalar_lea.hbm %s1537_s6, %s817_s30  ;;  %s1490_s20 = int_to_ptr.vmem [resolvable:$true] %s684_s20 }
  0x99   : > { %901 = vmatpush3.bf16.msra.mxu1 %v900_v7  ;;  %v909_v15 = vpack.c.bf16 %v506_v14, %v505_v13  ;;  %v508_v17 = vld [vmem:[#allocation8 + $0x48] sm:$0xff]  ;;  %v509_v19 = vld [vmem:[#allocation8 + $0x50] sm:$0xff]  ;;  %v510_v20 = vld [vmem:[#allocation8 + $0x58] sm:$0xff]  ;;  %s671_s16 = scalar_lea.sflag [#allocation4], %s1443_s2  ;;  %s1121_s0 = scalar_lea.vmem %s1490_s20, 128 }
  0x9a   : > { %902 = vmatprep.subr.bf16.mxu1 %v1210_v3  ;;  %v912_v18 = vpack.c.bf16 %v508_v17, %v507_v16  ;;  %v915_v21 = vpack.c.bf16 %v510_v20, %v509_v19  ;;  %v511_v22 = vld [vmem:[#allocation8 + $0x60] sm:$0xff]  ;;  %v512_v23 = vld [vmem:[#allocation8 + $0x68] sm:$0xff]  ;;  %v811_v26 = vld [vmem:[%s1534_s3] ss:$0 sm:$0xff]  ;;  %p1122_p3 = scmp.ne.s32.totalorder %s1490_s20, %s1121_s0  ;;  %p1560_p7 = scmp.ne.s32.totalorder %s1550_s9, 0 }
  0x9b   : > { %v918_v24 = vpack.c.bf16 %v512_v23, %v511_v22  ;;  %v334_v25 = vld [vmem:[%s1455_s10] sm:$0xf]  ;;  %v336_v27 = vld [vmem:[#allocation7] sm:$0xff]  ;;  %v337_v28 = vld [vmem:[#allocation7 + $0x8] sm:$0xff]  ;;  %s1211_s25 = smov [#allocation10]  }
  0x9c   : > { %v335_v30 = vunpack.c.l.bf16 %v334_v25  ;;  %v897_v32 = vpack.c.bf16 %v337_v28, %v336_v27  ;;  %v513_v33 = vld [vmem:[#allocation8 + $0x70] sm:$0xff]  ;;  %v514_v34 = vld [vmem:[#allocation8 + $0x78] sm:$0xff]  ;;  %p1123_p9 = pnand %p1122_p3, %p1560_p7  ;;  %s1125_s13 = sshll.u32 %s1211_s25, 4  ;;  %s1126_s13 = int_to_ptr.vmem [resolvable:$false] %s1125_s13 }
  0x9d   : > { %904 = vmatpush3.bf16.msra.mxu1 %v903_v9  ;;  %v921_v35 = vpack.c.bf16 %v514_v34, %v513_v33  ;;  %v814_v39 = vld [vmem:[%s1536_s5] ss:$0 sm:$0xff]  ;;  %s1127_s29 = scalar_lea.vmem %s1126_s13, 256  ;;  %p1128_p5 = scmp.lt.s32.totalorder %s1490_s20, %s1126_s13 }
  0x9e   : > { %905 = vmatprep.subr.bf16.mxu1 %v1210_v3  ;;  %p1124_p12 = pneg %p1123_p9  ;;  %p1129_p11 = scmp.lt.s32.totalorder %s1127_s29, %s1121_s0 }
  0xa0   : > { %p1130_p2 = por %p1129_p11, %p1128_p5 }
  0xa1   : > { %907 = vmatpush3.bf16.msra.mxu1 %v906_v12 }
  0xa2   : > { %908 = vmatprep.subr.bf16.mxu1 %v1210_v3  ;;  %p1131_p6 = pnand %p1130_p2, %p1124_p12 }
  0xa5   : > { %910 = vmatpush3.bf16.msra.mxu1 %v909_v15 }
  0xa6   : > { %911 = vmatprep.subr.bf16.mxu1 %v1210_v3 }
  0xa9   : > { %913 = vmatpush3.bf16.msra.mxu1 %v912_v18 }
  0xaa   : > { %914 = vmatprep.subr.bf16.mxu1 %v1210_v3 }
  0xad   : > { %916 = vmatpush3.bf16.msra.mxu1 %v915_v21 }
  0xae   : > { %917 = vmatprep.subr.bf16.mxu1 %v1210_v3 }
  0xb1   : > { %919 = vmatpush3.bf16.msra.mxu1 %v918_v24 }
  0xb2   : > { %920 = vmatprep.subr.bf16.mxu1 %v1210_v3 }
  0xb5   : > { %922 = vmatpush3.bf16.msra.mxu1 %v921_v35 }
 0x116   : > { %v342_v29 = vpop.permute.xlu0 %341 }
 0x117   : > { %v350_v31 = vmul.f32 %v811_v26, %v342_v29 }
 0x119   : > { %845 = vmatpush3.msra.mxu0 %v350_v31 }
 0x11a   : > { %847 = vmatmul.mubr.msk.f32.vlgmr.msra.gmra.mrb[0].mxu0 %vm351_vm1, %v335_v30  ;;  %896 = vmatprep.subr.bf16.mxu0 %v1210_v3 }
 0x11b   : > { %898 = vmatpush3.bf16.msra.mxu0 %v897_v32  ;;  %853 = vmatprep.mubr.msk.f32.mxu0 %vm1209_vm0, %v1208_v2 }
 0x11c   : > { %856 = vmatprep.subr.mxu0 %v1208_v2 }
 0x122   : > { %854 = vmatmul.mubr.msk.f32.vlgmr.msra.gmra.mrb[0].mxu0 %vm425_vm2, %v333_v1 }
 0x123   : > { %858 = vmatprep.mubr.msk.f32.mxu0 %vm1209_vm0, %v1208_v2 }
 0x1f5   : > { %v494_v36 = vpop.f32.mrb[0].mxu0 }
 0x1f6   : > { %v498_v37 = vmax.f32 %v494_v36, 0.0  ;;  %v855_v38 = vpop.f32.mrb[1].mxu0 }
 0x1f8   : > { %518 = vperm.xlu0 %1004, %v498_v37   ;;  %894 = vmatmul.mubr.f32.vlgmr.msra.gmra.mrb[0].mxu1 %v498_v37 }
 0x277   : > { %v519_v40 = vpop.permute.xlu0 %518 }
 0x278   : > { %v527_v41 = vmul.f32 %v814_v39, %v519_v40 }
 0x27a   : > { %857 = vmatpush3.msra.mxu0 %v527_v41 }
 0x27b   : > { %859 = vmatmul.mubr.msk.f32.vlgmr.msra.gmra.mrb[2].mxu0 %vm351_vm1, %v335_v30 }
 0x2cb   : > { %v664_v42 = vpop.f32.mrb[0].mxu1 }
 0x2cc   : > { %v895_v43 = vpop.f32.mrb[1].mxu1 }
 0x34e   : > { %v594_v44 = vpop.f32.mrb[2].mxu0 }
 0x34f   : > { %v665_v45 = vadd.f32 %v664_v42, %v594_v44  ;;  %v860_v46 = vpop.f32.mrb[3].mxu0 }
 0x351   : > { %v668_v47 = vmax.f32 %v665_v45, 0.0 }
 0x353   : > { %669 = vst [vmem:[%s332_s18] sm:$0xff] %v668_v47 }
 0x354   : > { %1134 = shalt.err (!%p1131_p6)
}
 0x355   : > { %s1135_s2 = scalar_lea.hbm %s1488_s14, 128  ;;  %s1139_s27 = scalar_lea.hbm %s1537_s6, 512 }
 0x356   : > { %p1136_p1 = scmp.ne.s32.totalorder %s1488_s14, %s1135_s2  ;;  %p1140_p0 = scmp.lt.u32.totalorder %s1488_s14, %s1537_s6 }
 0x357   : > { %p1141_p8 = scmp.lt.u32.totalorder %s1139_s27, %s1135_s2  ;;  %p1143_p3 = scmp.lt.u32.totalorder %s1135_s2, %s1488_s14 }
 0x358   : > { %p1137_p4 = pnand %p1136_p1, %p1560_p7 }
 0x359   : > { %p1142_p13 = por %p1141_p8, %p1140_p0 }
 0x35a   : > { %p1138_p10 = pneg %p1137_p4 }
 0x35b   : > { %p1144_p9 = por %p1143_p3, %p1142_p13 }
 0x35d   : > { %p1145_p12 = pnand %p1144_p9, %p1138_p10 }
 0x35f   : > { %1148 = shalt.err (!%p1145_p12)
}
 0x360   : > { %938 = dma.vmem_to_hbm [thread:$0]  (%p1560_p7), %s1490_s20, 128, %s1488_s14, %s671_s16  }
 0x361 PF: > { %p963_p5 = scmp.ge.s32.totalorder %s1199_s24, 2  ;;  %s696_s12 = sand.u32 1, %s1187_s21  }
 0x362   : > { %p1561_p11 = scmp.ne.s32.totalorder %s1545_s28, 0  ;;  %s697_s30 = scalar_lea.sflag [#allocation4], %s696_s12 }
 0x364   : > { %p955_p2 = pnand %p963_p5, %p1561_p11 }
 0x366   : > { %1182 = dma.done.wait (!%p955_p2), %s697_s30, 128  }
 0x367   : > { %1184 = vsyncadd (!%p955_p2), %s697_s30, 4294967168  ;;  %p23_p6 = scmp.ge.s32.totalorder %s1349_s26, 6   ;;  %s1562_s21 = smov %s1191_s22 }
 0x368   : > { %s1563_s22 = smov %s1195_s23  ;;  %s1564_s23 = smov %s1365_s11 }
 0x369   : > { %s1565_s24 = smov %s1349_s26  ;;  %25 = sbr.rel (!%p23_p6) target bundleno = 11 (0xb), region = 110 }
 0x370   :  { %702 = vsyncpa [#allocation3], 1 }
 0x371   :  { %704 = vsyncpa [#allocation3 + $0x1], 1 }
 0x372   :  { %705 = vsyncpa [#allocation6], 1 }
 0x373   :  { %707 = vsyncpa [#allocation6 + $0x1], 1 }
 0x374   :  { %708 = vsyncpa [#allocation9], 1 }
 0x375   :  { %709 = vsyncpa [#allocation4], 1 }
 0x376   :  { %711 = vsyncpa [#allocation4 + $0x1], 1 }

</bundles_post_ra>
